<compile_context>
chip_gen: v6e
topology: v6e:2x2x1
jax: 0.10.0
libtpu: 0.0.40
codegen_flags: <defaults>
</compile_context>

<pallas_src>
import functools

import jax
import jax.numpy as jnp
from jax import lax
from jax.experimental import pallas as pl
from jax.experimental.pallas import tpu as pltpu

LANES = 128
SUBLANES = 8
CHUNK_ROWS = 64                       # (64, 128) f32 per operand per inner step
TARGET_BLOCK_ROWS_F32 = 8192          # (8192, 128) f32 = 4 MiB per input block
VMEM_LIMIT_BYTES = 32 * 1024 * 1024   # 2 inputs x 2 bufs x 4 MiB = 16 MiB + slack
MIN_PALLAS_ELEMS = 1 << 20            # below this, fused XLA is faster


def _cdiv(a, b):
    return (a + b - 1) // b


def _num_tensorcores():
    """Best-effort TensorCore count (2 on v7x, 1 on v5e/v6e). Defaults to 1."""
    try:
        info = pltpu.get_tpu_info()
        for name in ("num_cores", "num_tensorcores", "tensorcore_count",
                     "num_cores_per_chip", "cores_per_chip"):
            v = getattr(info, name, None)
            if isinstance(v, int) and 1 <= v <= 8:
                return v
    except Exception:
        pass
    return 1


def _charbonnier_block_kernel(x_ref, y_ref, out_ref, *, eps, rows, block_rows,
                              chunk_rows, steps, masked):
    """Accumulate sqrt((x-y)^2 + eps) of one (block_rows, 128) block into a
    per-core (1, 8, 128) vreg-shaped partial sum."""
    c = pl.program_id(0)          # core axis (CORE_PARALLEL when >1 core)
    i = pl.program_id(1)          # sequential reduction axis

    @pl.when(i == 0)
    def _init():
        out_ref[...] = jnp.zeros_like(out_ref)

    nchunks = block_rows // chunk_rows
    row0 = (c * steps + i) * block_rows   # UNclamped global first row -> the
                                          # duplicated/partial blocks mask to 0.

    def body(j, acc):
        start = pl.multiple_of(j * chunk_rows, chunk_rows)
        xs = x_ref[pl.ds(start, chunk_rows), :].astype(jnp.float32)
        ys = y_ref[pl.ds(start, chunk_rows), :].astype(jnp.float32)
        d = xs - ys
        v = jnp.sqrt(d * d + jnp.float32(eps))
        if masked:  # static python bool: only emitted when the grid over-covers
            ridx = row0 + start + lax.broadcasted_iota(jnp.int32, v.shape, 0)
            v = jnp.where(ridx < rows, v, 0.0)
        # (chunk, 128) -> (chunk/8, 8, 128); summing axis 0 is pure VPU vreg adds.
        return acc + v.reshape(chunk_rows // SUBLANES, SUBLANES, LANES).sum(axis=0)

    acc = lax.fori_loop(0, nchunks, body,
                        jnp.zeros((SUBLANES, LANES), jnp.float32))
    out_ref[...] += acc.reshape(1, SUBLANES, LANES)


def charbonnier_loss(x, y, eps=1e-9, *, min_pallas_elems=MIN_PALLAS_ELEMS,
                     num_cores=None):
    """mean(sqrt((x - y)^2 + eps)) over all elements, any shape / float dtype."""
    assert x.shape == y.shape, (x.shape, y.shape)
    n = int(x.size)

    out_dtype = jnp.promote_types(x.dtype, y.dtype)
    if not jnp.issubdtype(out_dtype, jnp.floating):
        out_dtype = jnp.float32

    if n == 0:  # torch.mean over empty returns NaN
        return jnp.full((), jnp.nan, out_dtype)

    def _pointwise(a, b):
        d = a.astype(jnp.float32) - b.astype(jnp.float32)
        return jnp.sqrt(d * d + jnp.float32(eps))

    xf = jnp.ravel(x)   # reshape of a contiguous array: free (bitcast)
    yf = jnp.ravel(y)
    n_main = (n // LANES) * LANES
    rows = n_main // LANES

    # Small inputs (or <8 full lanes): the fused XLA elementwise+reduce wins.
    if n < min_pallas_elems or rows < SUBLANES:
        return jnp.mean(_pointwise(xf, yf)).astype(out_dtype)

    # ---- static tiling decisions -------------------------------------------
    itemsize = max(int(jnp.dtype(x.dtype).itemsize), 1)
    pack = max(1, 4 // itemsize)                 # 1 f32, 2 bf16, 4 int8/fp8
    target_rows = TARGET_BLOCK_ROWS_F32 * pack   # ~4 MiB per input block

    if rows >= target_rows:
        block_rows = target_rows
    elif rows >= CHUNK_ROWS:
        block_rows = (rows // CHUNK_ROWS) * CHUNK_ROWS
    else:                                        # rows in [8, 64)
        block_rows = (rows // SUBLANES) * SUBLANES
    chunk_rows = CHUNK_ROWS if block_rows % CHUNK_ROWS == 0 else block_rows

    total_blocks = _cdiv(rows, block_rows)
    cores = num_cores if num_cores is not None else _num_tensorcores()
    if not (cores > 1 and total_blocks >= 2 * cores
            and hasattr(pltpu, "CORE_PARALLEL")):
        cores = 1
    steps = _cdiv(total_blocks, cores)
    # Does the (cores, steps) grid over-cover the valid rows?  (partial last
    # block, or clamped duplicate blocks when total_blocks % cores != 0)
    masked = cores * steps * block_rows != rows

    # Present a lane-dense (rows, 128) view.  When n % 128 == 0 this is a pure
    # reshape (zero copies).  Otherwise only the prefix goes through the kernel
    # and the <128-element tail is summed with plain jnp below.
    if n_main == n:
        x2d = xf.reshape(rows, LANES)
        y2d = yf.reshape(rows, LANES)
    else:
        x2d = xf[:n_main].reshape(rows, LANES)
        y2d = yf[:n_main].reshape(rows, LANES)

    last_block = total_blocks - 1

    def row_block(c, i):
        # Clamp so every DMA stays on a valid block; over-covered grid points
        # re-read the last block and are zeroed by the in-kernel row mask.
        return (jnp.minimum(c * steps + i, last_block), 0)

    in_spec = pl.BlockSpec((block_rows, LANES), row_block)
    dim_sem = (pltpu.CORE_PARALLEL if cores > 1 else pltpu.ARBITRARY,
               pltpu.ARBITRARY)

    partials = pl.pallas_call(
        functools.partial(
            _charbonnier_block_kernel, eps=float(eps), rows=rows,
            block_rows=block_rows, chunk_rows=chunk_rows, steps=steps,
            masked=masked),
        out_shape=jax.ShapeDtypeStruct((cores, SUBLANES, LANES), jnp.float32),
        grid_spec=pltpu.PrefetchScalarGridSpec(
            num_scalar_prefetch=0,
            grid=(cores, steps),
            in_specs=[in_spec, in_spec],
            out_specs=pl.BlockSpec((1, SUBLANES, LANES), lambda c, i: (c, 0, 0)),
        ),
        compiler_params=pltpu.CompilerParams(
            dimension_semantics=dim_sem,
            vmem_limit_bytes=VMEM_LIMIT_BYTES,
        ),
    )(x2d, y2d)

    total = jnp.sum(partials, dtype=jnp.float32)     # one-time tiny epilogue reduce
    if n_main != n:                                  # <128-element lane tail
        total = total + jnp.sum(_pointwise(xf[n_main:], yf[n_main:]),
                                dtype=jnp.float32)
    return (total / jnp.float32(n)).astype(out_dtype)


def _ref_loss(x, y, eps):
    d = x.astype(jnp.float32) - y.astype(jnp.float32)
    return jnp.mean(jnp.sqrt(d * d + jnp.float32(eps)))


if __name__ == "__main__":
    eps = 1e-9  # matches the PyTorch module default
    key = jax.random.PRNGKey(0)
    k0, k1, k2, k3, k4, k5 = jax.random.split(key, 6)

    # 1) Demo input consistent with an image-restoration loss (NCHW).
    #    Force the Pallas path (auto heuristic would use the XLA fallback here).
    x = jax.random.normal(k0, (2, 4, 16, 16), dtype=jnp.float32)
    y = jax.random.normal(k1, (2, 4, 16, 16), dtype=jnp.float32)
    loss = charbonnier_loss(x, y, eps=eps, min_pallas_elems=0)
    jax.block_until_ready(loss)
    ref = _ref_loss(x, y, eps)
    assert jnp.allclose(loss, ref, rtol=1e-5, atol=1e-6), (loss, ref)
    # Auto path (fused XLA fallback for small inputs) must agree too.
    loss_auto = charbonnier_loss(x, y, eps=eps)
    assert jnp.allclose(loss_auto, ref, rtol=1e-5, atol=1e-6), (loss_auto, ref)

    # 2) Last-block masking path: rows (=100) not a multiple of the 64-row block.
    xm = jax.random.normal(k2, (2, 50, 128), dtype=jnp.float32)
    ym = jax.random.normal(k3, (2, 50, 128), dtype=jnp.float32)
    lm = charbonnier_loss(xm, ym, eps=eps, min_pallas_elems=0)
    assert jnp.allclose(lm, _ref_loss(xm, ym, eps), rtol=1e-5, atol=1e-6)

    # 3) Non-multiple-of-128 lane tail + bf16 inputs (dtype-aware tiling).
    xb = jax.random.normal(k4, (3, 5, 40, 41), dtype=jnp.bfloat16)
    yb = jax.random.normal(k5, (3, 5, 40, 41), dtype=jnp.bfloat16)
    lb = charbonnier_loss(xb, yb, eps=eps, min_pallas_elems=0)
    assert jnp.allclose(lb.astype(jnp.float32), _ref_loss(xb, yb, eps), rtol=2e-2)

    jax.block_until_ready((loss, loss_auto, lm, lb))
    print("KERNEL_OK")
</pallas_src>

<mosaic_0001>
module attributes {stable_mosaic.version = 11 : i64} {
  func.func @_charbonnier_block_kernel(%arg0: i32, %arg1: i32, %arg2: memref<16x128xf32, #tpu.memory_space<vmem>>, %arg3: memref<16x128xf32, #tpu.memory_space<vmem>>, %arg4: memref<1x8x128xf32, #tpu.memory_space<vmem>>) attributes {dimension_semantics = [#tpu.dimension_semantics<arbitrary>, #tpu.dimension_semantics<arbitrary>], iteration_bounds = array<i64: 1, 1>, scalar_prefetch = 0 : i64, scratch_operands = 0 : i64, tpu.core_type = #tpu.core_type<tc>, window_params = [{transform_indices = @transform_0, window_bounds = array<i64: 16, 128>}, {transform_indices = @transform_1, window_bounds = array<i64: 16, 128>}, {transform_indices = @transform_2, window_bounds = array<i64: 1, 8, 128>}]} {
    %c0_i32 = arith.constant 0 : i32
    %0 = arith.cmpi eq, %arg1, %c0_i32 : i32
    %1 = arith.extui %0 : i1 to i32
    %c0_i32_0 = arith.constant 0 : i32
    %2 = arith.cmpi ne, %1, %c0_i32_0 : i32
    scf.if %2 {
      %cst_11 = arith.constant 0.000000e+00 : f32
      %22 = vector.broadcast %cst_11 : f32 to vector<1x8x128xf32>
      %c0_12 = arith.constant 0 : index
      %c0_13 = arith.constant 0 : index
      %c0_14 = arith.constant 0 : index
      %23 = vector.load %arg4[%c0_12, %c0_13, %c0_14] : memref<1x8x128xf32, #tpu.memory_space<vmem>>, vector<1x8x128xf32>
      tpu.vector_store %arg4[%c0_12, %c0_13, %c0_14], %22 {strides = array<i32>} : memref<1x8x128xf32, #tpu.memory_space<vmem>>, vector<1x8x128xf32>,
    } else {
    }
    %cst = arith.constant 0.000000e+00 : f32
    %3 = vector.broadcast %cst : f32 to vector<8x128xf32>
    %c0_i32_1 = arith.constant 0 : i32
    %c16_i32 = arith.constant 16 : i32
    %4 = arith.muli %c0_i32_1, %c16_i32 : i32
    %5 = tpu.assume_multiple %4, 16 : i32
    %6 = arith.index_cast %5 : i32 to index
    %c0 = arith.constant 0 : index
    %7 = vector.load %arg2[%6, %c0] : memref<16x128xf32, #tpu.memory_space<vmem>>, vector<16x128xf32>
    %8 = arith.index_cast %5 : i32 to index
    %c0_2 = arith.constant 0 : index
    %9 = vector.load %arg3[%8, %c0_2] : memref<16x128xf32, #tpu.memory_space<vmem>>, vector<16x128xf32>
    %10 = arith.subf %7, %9 : vector<16x128xf32>
    %11 = arith.mulf %10, %10 : vector<16x128xf32>
    %cst_3 = arith.constant 9.99999971E-10 : f32
    %12 = vector.broadcast %cst_3 : f32 to vector<16x128xf32>
    %13 = arith.addf %11, %12 : vector<16x128xf32>
    %14 = math.sqrt %13 : vector<16x128xf32>
    %15 = vector.shape_cast %14 : vector<16x128xf32> to vector<2x8x128xf32>
    %cst_4 = arith.constant dense<0.000000e+00> : vector<8x128xf32>
    %16 = vector.multi_reduction <add>, %15, %cst_4 [0] : vector<2x8x128xf32> to vector<8x128xf32>
    %17 = arith.addf %3, %16 : vector<8x128xf32>
    %c1_i32 = arith.constant 1 : i32
    %c0_5 = arith.constant 0 : index
    %c0_6 = arith.constant 0 : index
    %c0_7 = arith.constant 0 : index
    %18 = vector.load %arg4[%c0_5, %c0_6, %c0_7] : memref<1x8x128xf32, #tpu.memory_space<vmem>>, vector<1x8x128xf32>
    %19 = vector.shape_cast %17 : vector<8x128xf32> to vector<1x8x128xf32>
    %20 = arith.addf %18, %19 : vector<1x8x128xf32>
    %c0_8 = arith.constant 0 : index
    %c0_9 = arith.constant 0 : index
    %c0_10 = arith.constant 0 : index
    %21 = vector.load %arg4[%c0_8, %c0_9, %c0_10] : memref<1x8x128xf32, #tpu.memory_space<vmem>>, vector<1x8x128xf32>
    tpu.vector_store %arg4[%c0_8, %c0_9, %c0_10], %20 {strides = array<i32>} : memref<1x8x128xf32, #tpu.memory_space<vmem>>, vector<1x8x128xf32>,
    return
  }
  func.func @transform_0(%arg0: i32, %arg1: i32) -> (i32, i32) {
    %c1_i32 = arith.constant 1 : i32
    %0 = arith.muli %arg0, %c1_i32 : i32
    %1 = arith.addi %0, %arg1 : i32
    %c0_i32 = arith.constant 0 : i32
    %2 = arith.minsi %1, %c0_i32 : i32
    %c0_i32_0 = arith.constant 0 : i32
    %c0_i32_1 = arith.constant 0 : i32
    return %2, %c0_i32_0 : i32, i32
  }
  func.func @transform_1(%arg0: i32, %arg1: i32) -> (i32, i32) {
    %c1_i32 = arith.constant 1 : i32
    %0 = arith.muli %arg0, %c1_i32 : i32
    %1 = arith.addi %0, %arg1 : i32
    %c0_i32 = arith.constant 0 : i32
    %2 = arith.minsi %1, %c0_i32 : i32
    %c0_i32_0 = arith.constant 0 : i32
    %c0_i32_1 = arith.constant 0 : i32
    return %2, %c0_i32_0 : i32, i32
  }
  func.func @transform_2(%arg0: i32, %arg1: i32) -> (i32, i32, i32) {
    %c0_i32 = arith.constant 0 : i32
    %c0_i32_0 = arith.constant 0 : i32
    %c0_i32_1 = arith.constant 0 : i32
    return %arg0, %c0_i32, %c0_i32_0 : i32, i32, i32
  }
}

</mosaic_0001>

<bundles_post_ra>
// kernel: tpu_custom_call.1
= control target key start
LH: loop header
LB: loop body
LE: loop exit
PB: predicated region body
PF: predicated region fallthrough
CT: control target
= control target key end

     0   :  { %7 = vsyncpa [#allocation3], 0  ;;  %s219_s0 = inlined_call_operand.hbm [shape: f32[16,128], index: 0, kind: input, shape index: {}]   ;;  %s220_s1 = inlined_call_operand.hbm [shape: f32[16,128], index: 1, kind: input, shape index: {}]   ;;  %s221_s2 = inlined_call_operand.hbm [shape: f32[1,8,128], index: 2, kind: output, shape index: {}]  }
   0x1   :  { %8 = vsyncpa [#allocation6], 0 }
   0x2   :  { %9 = vsyncpa [#allocation4], 0  ;;  %s190_s9 = smov [#allocation2]  }
   0x3   :  { %s21_s10 = sshll.u32 %s190_s9, 4  ;;  %s22_s10 = int_to_ptr.vmem [resolvable:$true] %s21_s10 }
   0x4   :  { %s132_s11 = scalar_lea.vmem %s22_s10, 256  ;;  %p137_p1 = scmp.lt.s32.totalorder %s22_s10, %s22_s10 }
   0x5   :  { %p133_p0 = scmp.ne.s32.totalorder %s22_s10, %s132_s11  ;;  %p138_p2 = scmp.lt.s32.totalorder %s132_s11, %s132_s11 }
   0x7   :  { %p139_p3 = por %p138_p2, %p137_p1 }
   0x9   :  { %p140_p4 = pnand %p139_p3, %p133_p0 }
   0xb   :  { %143 = shalt.err (!%p140_p4)
}
   0xc   :  { %s191_s12 = smov 128   ;;  %s192_s13 = smov 8  }
   0xd   :  { %27 = dma.hbm_to_vmem [thread:$0]  %s219_s0, 256, %s22_s10, [#allocation3], %s191_s12, %s191_s12, %s192_s13  }
   0xe   :  { %s193_s16 = smov [#allocation5]  }
   0xf   :  { %s39_s17 = sshll.u32 %s193_s16, 4  ;;  %s40_s17 = int_to_ptr.vmem [resolvable:$true] %s39_s17 }
  0x10   :  { %s152_s18 = scalar_lea.vmem %s40_s17, 256  ;;  %p157_p6 = scmp.lt.s32.totalorder %s40_s17, %s40_s17 }
  0x11   :  { %p153_p5 = scmp.ne.s32.totalorder %s40_s17, %s152_s18  ;;  %p158_p7 = scmp.lt.s32.totalorder %s152_s18, %s152_s18 }
  0x13   :  { %p159_p8 = por %p158_p7, %p157_p6 }
  0x15   :  { %p160_p9 = pnand %p159_p8, %p153_p5 }
  0x17   :  { %163 = shalt.err (!%p160_p9)
}
  0x18   :  { %45 = dma.hbm_to_vmem [thread:$0]  %s220_s1, 256, %s40_s17, [#allocation6], %s191_s12, %s191_s12, %s192_s13  }
  0x19   :  { %184 = dma.done.wait [#allocation3], 256  }
  0x1a   :  { %185 = vsyncadd [#allocation3], 4294967040 }
  0x1b   :  { %186 = dma.done.wait [#allocation6], 256  }
  0x1c   :  { %187 = vsyncadd [#allocation6], 4294967040  ;;  %v65_v0 = vld [vmem:[#allocation2] sm:$0xff]  ;;  %v66_v1 = vld [vmem:[#allocation2 + $0x8] sm:$0xff]  ;;  %s194_s0 = smov [#allocation7]  }
  0x1d   :  { %v67_v2 = vld [vmem:[#allocation5] sm:$0xff]  ;;  %v68_v3 = vld [vmem:[#allocation5 + $0x8] sm:$0xff]  ;;  %s100_s1 = sshll.u32 %s194_s0, 4  ;;  %s101_s1 = int_to_ptr.vmem [resolvable:$true] %s100_s1 }
  0x1e   :  { %v69_v4 = vsub.f32 %v65_v0, %v67_v2  ;;  %v70_v5 = vsub.f32 %v66_v1, %v68_v3  ;;  %s164_s21 = scalar_lea.vmem %s101_s1, 128  ;;  %p169_p11 = scmp.lt.s32.totalorder %s101_s1, %s101_s1 }
  0x1f   :  { %p165_p10 = scmp.ne.s32.totalorder %s101_s1, %s164_s21  ;;  %p170_p12 = scmp.lt.s32.totalorder %s164_s21, %s164_s21 }
  0x20   :  { %v71_v6 = vmul.f32 %v69_v4, %v69_v4  ;;  %v72_v7 = vmul.f32 %v70_v5, %v70_v5 }
  0x21   :  { %p171_p13 = por %p170_p12, %p169_p11 }
  0x22   :  { %v73_v8 = vadd.f32 1e-09, %v71_v6  ;;  %v74_v9 = vadd.f32 1e-09, %v72_v7 }
  0x23   :  { %p172_p0 = pnand %p171_p13, %p165_p10 }
  0x24   :  { %120 = vrsqrt.f32 %v73_v8  ;;  %vm77_vm0 = vcmp.eq.f32.partialorder %v73_v8, inf  ;;  %v80_v11 = vand.u32 2147483648, %v73_v8  ;;  %vm79_vm1 = vcmp.eq.f32.partialorder %v73_v8, 0.0 }
  0x25   :  { %122 = vrsqrt.f32 %v74_v9  ;;  %vm84_vm2 = vcmp.eq.f32.partialorder %v74_v9, inf  ;;  %v87_v14 = vand.u32 2147483648, %v74_v9  ;;  %vm86_vm3 = vcmp.eq.f32.partialorder %v74_v9, 0.0 }
  0x31   :  { %v121_v10 = vpop.eup %120 }
  0x32   :  { %v123_v12 = vpop.eup %122  ;;  %v76_v13 = vmul.f32 %v121_v10, %v73_v8 }
  0x33   :  { %v83_v15 = vmul.f32 %v123_v12, %v74_v9 }
  0x34   :  { %v78_v16 = vsel %vm77_vm0, %v73_v8, %v76_v13 }
  0x35   :  { %v81_v17 = vsel %vm79_vm1, %v80_v11, %v78_v16  ;;  %v85_v18 = vsel %vm84_vm2, %v74_v9, %v83_v15 }
  0x36   :  { %v88_v19 = vsel %vm86_vm3, %v87_v14, %v85_v18 }
  0x37   :  { %v89_v20 = vadd.f32 %v88_v19, %v81_v17 }
  0x39   :  { %93 = vst [vmem:[#allocation7] sm:$0xff] %v89_v20 }
  0x3a   :  { %175 = shalt.err (!%p172_p0)
}
  0x3b   :  { %103 = dma.vmem_to_hbm [thread:$0]  %s101_s1, 128, %s221_s2, [#allocation4]  }
  0x3c   :  { %188 = dma.done.wait [#allocation4], 128  }
  0x3d   :  { %189 = vsyncadd [#allocation4], 4294967168 }
  0x3e   :  { %107 = vsyncpa [#allocation3], 1 }
  0x3f   :  { %108 = vsyncpa [#allocation6], 1 }
  0x40   :  { %109 = vsyncpa [#allocation4], 1 }

</bundles_post_ra>
